<compile_context>
chip_gen: v5e
topology: v5e:2x2
jax: 0.10.0
libtpu: 0.0.40
codegen_flags: <defaults>
</compile_context>

<pallas_src>
import jax
import jax.numpy as jnp
from jax.experimental import pallas as pl
from jax.experimental.pallas import tpu as pltpu


# ---------------------------------------------------------------------------
# Kernel: fused (x @ W1 + b1) -> leaky_relu -> (h @ W2 + b2) on one row tile.
# ---------------------------------------------------------------------------
def mp_kernel(x_ref, w1_ref, b1_ref, w2_ref, b2_ref, o_ref):
    x = x_ref[...]                                                  # (tm, Cp)
    h = jnp.dot(x, w1_ref[...], preferred_element_type=jnp.float32)
    h = h + b1_ref[...]                                             # (tm, Hp)
    # F.leaky_relu default negative_slope = 0.01
    h = jnp.where(h > 0, h, 0.01 * h)
    y = jnp.dot(h.astype(w2_ref.dtype), w2_ref[...],
                preferred_element_type=jnp.float32)
    y = y + b2_ref[...]                                             # (tm, Cp)
    o_ref[...] = y.astype(o_ref.dtype)


# ---------------------------------------------------------------------------
# Parameter preparation (done ONCE per parameter set, not per forward).
# ---------------------------------------------------------------------------
def prepare_mp_params(w1, b1, w2, b2, *, channel, dtype=jnp.float32):
    """w1: (C, H), b1: (H,), w2: (H, C), b2: (C,).

    Returns block-diagonal / tiled versions so `pack` logical rows can be
    processed as one lane-dense 128-wide row, plus the pack factor.
    """
    C = channel
    pack = max(1, 128 // C)
    eye = jnp.eye(pack, dtype=dtype)
    w1_bd = jnp.kron(eye, w1.astype(dtype))                 # (pack*C, pack*H)
    w2_bd = jnp.kron(eye, w2.astype(dtype))                 # (pack*H, pack*C)
    b1_bd = jnp.tile(b1.astype(dtype), pack).reshape(1, -1)  # (1, pack*H)
    b2_bd = jnp.tile(b2.astype(dtype), pack).reshape(1, -1)  # (1, pack*C)
    return (w1_bd, b1_bd, w2_bd, b2_bd, pack)


def _pick_tile(Mp, tm):
    """Tile size in packed rows: multiple of 8, <= tm, and small enough that
    the grid has several steps (megacore sharding + DMA/compute overlap)."""
    if Mp <= 16:
        return Mp                          # tiny input: one block == full dim
    tm_req = max(8, (tm // 8) * 8)
    cand = -(-Mp // 4)                     # aim for >= ~4 grid steps
    cand = max(8, (cand // 8) * 8)
    return min(tm_req, cand)


# ---------------------------------------------------------------------------
# Forward wrapper.
# ---------------------------------------------------------------------------
def mp_forward(x, params, *, tm=2048, io_dtype=None):
    """x: (B, L, C) -> (B, L, C).  `params` from prepare_mp_params."""
    w1_bd, b1_bd, w2_bd, b2_bd, pack = params
    B, L, C = x.shape
    Cp = w1_bd.shape[0]
    assert Cp == pack * C

    out_dtype = x.dtype
    dtype = out_dtype if io_dtype is None else io_dtype
    x = x.astype(dtype)

    M = B * L
    Mp = pl.cdiv(M, pack)                  # packed rows
    M_packed = Mp * pack

    x2d = x.reshape(M, C)
    if M_packed != M:
        # pad at most pack-1 rows so the contiguous reshape to (Mp, Cp) works
        x2d = jnp.pad(x2d, ((0, M_packed - M), (0, 0)))
    xp = x2d.reshape(Mp, Cp)               # zero-cost, lane-dense packing

    tm_eff = _pick_tile(Mp, tm)
    grid_m = pl.cdiv(Mp, tm_eff)           # last block may be ragged (masked)

    itemsize = jnp.dtype(dtype).itemsize
    tile_bytes = tm_eff * Cp * itemsize
    # double-buffered x + out tiles, resident weights, headroom; cap for v7x
    vmem_limit = int(min(48 * 1024 * 1024, max(32 * 1024 * 1024, 8 * tile_bytes)))

    out_p = pl.pallas_call(
        mp_kernel,
        out_shape=jax.ShapeDtypeStruct((Mp, Cp), dtype),
        grid_spec=pltpu.PrefetchScalarGridSpec(
            num_scalar_prefetch=0,
            grid=(grid_m,),
            in_specs=[
                pl.BlockSpec((tm_eff, Cp), lambda i: (i, 0)),    # x (streamed)
                pl.BlockSpec(w1_bd.shape, lambda i: (0, 0)),     # W1 (resident)
                pl.BlockSpec(b1_bd.shape, lambda i: (0, 0)),     # b1 (resident)
                pl.BlockSpec(w2_bd.shape, lambda i: (0, 0)),     # W2 (resident)
                pl.BlockSpec(b2_bd.shape, lambda i: (0, 0)),     # b2 (resident)
            ],
            out_specs=pl.BlockSpec((tm_eff, Cp), lambda i: (i, 0)),
        ),
        compiler_params=pltpu.CompilerParams(
            dimension_semantics=("parallel",),
            vmem_limit_bytes=vmem_limit,
        ),
    )(xp, w1_bd, b1_bd, w2_bd, b2_bd)

    out2d = out_p.reshape(M_packed, C)
    if M_packed != M:
        out2d = out2d[:M]
    return out2d.reshape(B, L, C).astype(out_dtype)


# ---------------------------------------------------------------------------
# Pure-JAX reference (matches the PyTorch module semantics).
# ---------------------------------------------------------------------------
def mp_reference(x, w1, b1, w2, b2):
    h = jnp.einsum("blc,ch->blh", x, w1) + b1
    h = jnp.where(h > 0, h, 0.01 * h)
    return jnp.einsum("blh,hc->blc", h, w2) + b2


if __name__ == "__main__":
    # Small shapes consistent with the module: channel must be divisible by 4.
    B, L, C = 2, 8, 32
    H = C // 4

    key = jax.random.PRNGKey(0)
    kx, kw1, kb1, kw2, kb2 = jax.random.split(key, 5)

    x = jax.random.normal(kx, (B, L, C), dtype=jnp.float32)

    # Conv1d kernel-size-1 weights in matmul layout: W = conv.weight[:, :, 0].T
    w1 = jax.random.normal(kw1, (C, H), dtype=jnp.float32) * 0.1   # conv1
    b1 = jax.random.normal(kb1, (H,), dtype=jnp.float32) * 0.1
    w2 = jax.random.normal(kw2, (H, C), dtype=jnp.float32) * 0.1   # conv2
    b2 = jax.random.normal(kb2, (C,), dtype=jnp.float32) * 0.1

    params = prepare_mp_params(w1, b1, w2, b2, channel=C)

    # 1) small input, single full-size block
    out = jax.block_until_ready(mp_forward(x, params))
    ref = mp_reference(x, w1, b1, w2, b2)
    assert out.shape == (B, L, C)
    assert jnp.allclose(out, ref, atol=1e-5, rtol=1e-5)

    # 2) unaligned input exercising pack padding + ragged last grid block
    #    (M = 303 rows -> 76 packed rows, tile of 16 -> grid of 5, last ragged)
    B2, L2 = 3, 101
    x2 = jax.random.normal(jax.random.PRNGKey(1), (B2, L2, C), dtype=jnp.float32)
    out2 = jax.block_until_ready(mp_forward(x2, params, tm=16))
    ref2 = mp_reference(x2, w1, b1, w2, b2)
    assert out2.shape == (B2, L2, C)
    assert jnp.allclose(out2, ref2, atol=1e-5, rtol=1e-5)

    # 3) optional bf16 I/O path (halves HBM traffic; looser tolerance)
    out3 = jax.block_until_ready(mp_forward(x2, params, io_dtype=jnp.bfloat16))
    assert out3.shape == (B2, L2, C)
    assert jnp.allclose(out3, ref2, atol=3e-2, rtol=3e-2)

    print("KERNEL_OK")
</pallas_src>

<mosaic_0001>
module attributes {stable_mosaic.version = 11 : i64} {
  func.func @mp_kernel(%arg0: i32, %arg1: memref<4x128xf32, #tpu.memory_space<vmem>>, %arg2: memref<128x32xf32, #tpu.memory_space<vmem>>, %arg3: memref<1x32xf32, #tpu.memory_space<vmem>>, %arg4: memref<32x128xf32, #tpu.memory_space<vmem>>, %arg5: memref<1x128xf32, #tpu.memory_space<vmem>>, %arg6: memref<4x128xf32, #tpu.memory_space<vmem>>) attributes {dimension_semantics = [#tpu.dimension_semantics<parallel>], iteration_bounds = array<i64: 1>, scalar_prefetch = 0 : i64, scratch_operands = 0 : i64, tpu.core_type = #tpu.core_type<tc>, window_params = [{transform_indices = @transform_0, window_bounds = array<i64: 4, 128>}, {pipeline_mode = #tpu.pipeline_mode<synchronous>, transform_indices = @transform_1, window_bounds = array<i64: 128, 32>}, {pipeline_mode = #tpu.pipeline_mode<synchronous>, transform_indices = @transform_2, window_bounds = array<i64: 1, 32>}, {pipeline_mode = #tpu.pipeline_mode<synchronous>, transform_indices = @transform_3, window_bounds = array<i64: 32, 128>}, {pipeline_mode = #tpu.pipeline_mode<synchronous>, transform_indices = @transform_4, window_bounds = array<i64: 1, 128>}, {transform_indices = @transform_5, window_bounds = array<i64: 4, 128>}]} {
    %c0 = arith.constant 0 : index
    %c0_0 = arith.constant 0 : index
    %0 = vector.load %arg1[%c0, %c0_0] : memref<4x128xf32, #tpu.memory_space<vmem>>, vector<4x128xf32>
    %c0_1 = arith.constant 0 : index
    %c0_2 = arith.constant 0 : index
    %1 = vector.load %arg2[%c0_1, %c0_2] : memref<128x32xf32, #tpu.memory_space<vmem>>, vector<128x32xf32>
    %cst = arith.constant dense<0.000000e+00> : vector<4x32xf32>
    %2 = tpu.matmul %0, %1, %cst {dimension_numbers = #tpu.dot_dimension_numbers<[1], [0], [0], [1], [0, 0, 1, 1], [], []>} : vector<4x128xf32>, vector<128x32xf32>, vector<4x32xf32> -> vector<4x32xf32>
    %c0_3 = arith.constant 0 : index
    %c0_4 = arith.constant 0 : index
    %3 = vector.load %arg3[%c0_3, %c0_4] : memref<1x32xf32, #tpu.memory_space<vmem>>, vector<1x32xf32>
    %4 = vector.broadcast %3 : vector<1x32xf32> to vector<4x32xf32>
    %5 = arith.addf %2, %4 : vector<4x32xf32>
    %cst_5 = arith.constant 0.000000e+00 : f32
    %6 = vector.broadcast %cst_5 : f32 to vector<4x32xf32>
    %7 = arith.cmpf ogt, %5, %6 : vector<4x32xf32>
    %cst_6 = arith.constant 0.00999999977 : f32
    %8 = vector.broadcast %cst_6 : f32 to vector<4x32xf32>
    %9 = arith.mulf %8, %5 : vector<4x32xf32>
    %10 = arith.select %7, %5, %9 : vector<4x32xi1>, vector<4x32xf32>
    %c0_7 = arith.constant 0 : index
    %c0_8 = arith.constant 0 : index
    %11 = vector.load %arg4[%c0_7, %c0_8] : memref<32x128xf32, #tpu.memory_space<vmem>>, vector<32x128xf32>
    %cst_9 = arith.constant dense<0.000000e+00> : vector<4x128xf32>
    %12 = tpu.matmul %10, %11, %cst_9 {dimension_numbers = #tpu.dot_dimension_numbers<[1], [0], [0], [1], [0, 0, 1, 1], [], []>} : vector<4x32xf32>, vector<32x128xf32>, vector<4x128xf32> -> vector<4x128xf32>
    %c0_10 = arith.constant 0 : index
    %c0_11 = arith.constant 0 : index
    %13 = vector.load %arg5[%c0_10, %c0_11] : memref<1x128xf32, #tpu.memory_space<vmem>>, vector<1x128xf32>
    %14 = vector.broadcast %13 : vector<1x128xf32> to vector<4x128xf32>
    %15 = arith.addf %12, %14 : vector<4x128xf32>
    %c0_12 = arith.constant 0 : index
    %c0_13 = arith.constant 0 : index
    %16 = vector.load %arg6[%c0_12, %c0_13] : memref<4x128xf32, #tpu.memory_space<vmem>>, vector<4x128xf32>
    tpu.vector_store %arg6[%c0_12, %c0_13], %15 {strides = array<i32>} : memref<4x128xf32, #tpu.memory_space<vmem>>, vector<4x128xf32>,
    return
  }
  func.func @transform_0(%arg0: i32) -> (i32, i32) {
    %c0_i32 = arith.constant 0 : i32
    %c0_i32_0 = arith.constant 0 : i32
    return %arg0, %c0_i32 : i32, i32
  }
  func.func @transform_1(%arg0: i32) -> (i32, i32) {
    %c0_i32 = arith.constant 0 : i32
    %c0_i32_0 = arith.constant 0 : i32
    %c0_i32_1 = arith.constant 0 : i32
    return %c0_i32, %c0_i32_0 : i32, i32
  }
  func.func @transform_2(%arg0: i32) -> (i32, i32) {
    %c0_i32 = arith.constant 0 : i32
    %c0_i32_0 = arith.constant 0 : i32
    %c0_i32_1 = arith.constant 0 : i32
    return %c0_i32, %c0_i32_0 : i32, i32
  }
  func.func @transform_3(%arg0: i32) -> (i32, i32) {
    %c0_i32 = arith.constant 0 : i32
    %c0_i32_0 = arith.constant 0 : i32
    %c0_i32_1 = arith.constant 0 : i32
    return %c0_i32, %c0_i32_0 : i32, i32
  }
  func.func @transform_4(%arg0: i32) -> (i32, i32) {
    %c0_i32 = arith.constant 0 : i32
    %c0_i32_0 = arith.constant 0 : i32
    %c0_i32_1 = arith.constant 0 : i32
    return %c0_i32, %c0_i32_0 : i32, i32
  }
  func.func @transform_5(%arg0: i32) -> (i32, i32) {
    %c0_i32 = arith.constant 0 : i32
    %c0_i32_0 = arith.constant 0 : i32
    return %arg0, %c0_i32 : i32, i32
  }
}

</mosaic_0001>

<bundles_post_ra>
// kernel: tpu_custom_call.1
= control target key start
LH: loop header
LB: loop body
LE: loop exit
PB: predicated region body
PF: predicated region fallthrough
CT: control target
= control target key end

     0   :  { %s247_s0 = inlined_call_operand.vmem [shape: f32[4,128], index: 0, kind: input, shape index: {}]   ;;  %s248_s1 = inlined_call_operand.vmem [shape: f32[128,32], index: 1, kind: input, shape index: {}]   ;;  %s249_s2 = inlined_call_operand.vmem [shape: f32[1,32], index: 2, kind: input, shape index: {}]   ;;  %s250_s3 = inlined_call_operand.vmem [shape: f32[32,128], index: 3, kind: input, shape index: {}]   ;;  %s251_s4 = inlined_call_operand.vmem [shape: f32[1,128], index: 4, kind: input, shape index: {}]   ;;  %s252_s5 = inlined_call_operand.hbm [shape: f32[4,128], index: 5, kind: output, shape index: {}]  }
   0x1   :  { %v37_v0 = vld [vmem:[%s248_s1 + $0x78] sm:$0xff]  ;;  %v36_v1 = vld [vmem:[%s248_s1 + $0x70] sm:$0xff]  ;;  %v35_v2 = vld [vmem:[%s248_s1 + $0x68] sm:$0xff] }
   0x2   :  { %42 = vmatpush.msra.mxu0 %v37_v0  ;;  %v34_v3 = vld [vmem:[%s248_s1 + $0x60] sm:$0xff]  ;;  %v68_v4 = vld [vmem:[%s250_s3 + $0x18] sm:$0xff] }
   0x3   :  { %v33_v5 = vld [vmem:[%s248_s1 + $0x58] sm:$0xff]  ;;  %89 = vmatpush.msra.mxu1 %v68_v4 }
   0x4   :  { %43 = vmatpush.msra.mxu0 %v36_v1 }
   0x6   :  { %44 = vmatpush.msra.mxu0 %v35_v2 }
   0x8   :  { %45 = vmatpush.msra.mxu0 %v34_v3 }
   0x9   :  { %10 = vsyncpa [#allocation3], 0  ;;  %v32_v6 = vld [vmem:[%s248_s1 + $0x50] sm:$0xff]  ;;  %v31_v7 = vld [vmem:[%s248_s1 + $0x48] sm:$0xff]  ;;  %vm73_vm1 = vcmask 261120   ;;  %s144_s12 = smov [#allocation2]  }
   0xa   :  { %46 = vmatpush.msra.mxu0 %v33_v5  ;;  %v30_v8 = vld [vmem:[%s248_s1 + $0x40] sm:$0xff]  ;;  %v29_v9 = vld [vmem:[%s248_s1 + $0x38] sm:$0xff]  ;;  %v28_v10 = vld [vmem:[%s248_s1 + $0x30] sm:$0xff]  ;;  %s103_s13 = sshll.u32 %s144_s12, 4  ;;  %s105_s15 = sshll.u32 %s252_s5, 4  ;;  %s104_s13 = int_to_ptr.vmem [resolvable:$true] %s103_s13  ;;  %s106_s15 = int_to_ptr.hbm [resolvable:$true] %s105_s15 }
   0xb   :  { %v27_v11 = vld [vmem:[%s248_s1 + $0x28] sm:$0xff]  ;;  %v26_v12 = vld [vmem:[%s248_s1 + $0x20] sm:$0xff]  ;;  %v25_v13 = vld [vmem:[%s248_s1 + $0x18] sm:$0xff] }
   0xc   :  { %47 = vmatpush.msra.mxu0 %v32_v6  ;;  %v24_v14 = vld [vmem:[%s248_s1 + $0x10] sm:$0xff]  ;;  %v23_v15 = vld [vmem:[%s248_s1 + $0x8] sm:$0xff]  ;;  %v22_v16 = vld [vmem:[%s248_s1] sm:$0xff] }
   0xd   :  { %v21_v17 = vld [vmem:[%s247_s0] sm:$0xf]  ;;  %v67_v18 = vld [vmem:[%s250_s3 + $0x10] sm:$0xff]  ;;  %v66_v19 = vld [vmem:[%s250_s3 + $0x8] sm:$0xff] }
   0xe   :  { %48 = vmatpush.msra.mxu0 %v31_v7  ;;  %90 = vmatpush.msra.mxu1 %v67_v18  ;;  %v65_v20 = vld [vmem:[%s250_s3] sm:$0xff] }
   0xf   :  { %v116_v21 = vld [vmem:[%s249_s2] ss:$0 sm:$0xff] }
  0x10   :  { %49 = vmatpush.msra.mxu0 %v30_v8  ;;  %91 = vmatpush.msra.mxu1 %v66_v19  ;;  %v117_v26 = vld [vmem:[%s251_s4] ss:$0 sm:$0xff] }
  0x12   :  { %50 = vmatpush.msra.mxu0 %v29_v9  ;;  %92 = vmatpush.msra.mxu1 %v65_v20 }
  0x14   :  { %51 = vmatpush.msra.mxu0 %v28_v10 }
  0x16   :  { %52 = vmatpush.msra.mxu0 %v27_v11 }
  0x18   :  { %53 = vmatpush.msra.mxu0 %v26_v12 }
  0x1a   :  { %54 = vmatpush.msra.mxu0 %v25_v13 }
  0x1c   :  { %55 = vmatpush.msra.mxu0 %v24_v14 }
  0x1e   :  { %56 = vmatpush.msra.mxu0 %v23_v15 }
  0x20   :  { %57 = vmatpush.msra.mxu0 %v22_v16 }
  0x21   :  { %58 = vmatmul.f32.vlgmr.msra.gmra.mxu0 %v21_v17 }
  0x9e   :  { %v59_v22 = vpop.f32.mrf.mxu0 }
  0x9f   :  { %v60_v23 = vadd.f32 %v116_v21, %v59_v22 }
  0xa1   :  { %v63_v24 = vmul.f32 0.01, %v60_v23  ;;  %vm62_vm0 = vcmp.gt.f32.partialorder %v60_v23, 0.0 }
  0xa3   :  { %v64_v25 = vsel %vm62_vm0, %v60_v23, %v63_v24 }
  0xa4   :  { %114 = vmatmul.msk.f32.vlgmr.msra.gmra.mxu1 %vm73_vm1, %v64_v25 }
 0x121   :  { %v94_v27 = vpop.f32.mrf.mxu1 }
 0x122   :  { %v95_v28 = vadd.f32 %v117_v26, %v94_v27 }
 0x124   :  { %97 = vst [vmem:[#allocation2] sm:$0xf] %v95_v28 }
 0x125   :  { %108 = dma.vmem_to_hbm [thread:$0]  %s104_s13, 64, %s106_s15, [#allocation3]  }
 0x126   :  { %142 = dma.done.wait [#allocation3], 64  }
 0x127   :  { %143 = vsyncadd [#allocation3], 4294967232 }
 0x128   :  { %113 = vsyncpa [#allocation3], 1 }

</bundles_post_ra>
